<compile_context>
chip_gen: v5e
topology: v5e:2x2
jax: 0.10.0
libtpu: 0.0.40
codegen_flags: <defaults>
</compile_context>

<pallas_src>
import functools

import jax
import jax.numpy as jnp
from jax.experimental import pallas as pl
from jax.experimental.pallas import tpu as pltpu

BN_EPS = 1e-5


# ----------------------------------------------------------------------------
# Pallas kernels
# ----------------------------------------------------------------------------
def _bn_train(acc, gamma, beta, eps):
    """Training-mode BatchNorm on a (C, M) tile: per-channel batch stats."""
    m = jnp.float32(acc.shape[1])
    mean = jnp.sum(acc, axis=1, keepdims=True) / m
    d = acc - mean
    var = jnp.sum(d * d, axis=1, keepdims=True) / m      # biased variance
    return d * (gamma * jax.lax.rsqrt(var + eps)) + beta


def _conv_bn_relu_kernel(w_ref, p_ref, b_ref, g_ref, beta_ref, o_ref, *, eps):
    """out = relu(BN(W @ P + b));  W:(C,K)  P:(K,M)  out:(C,M)."""
    acc = jnp.dot(w_ref[...], p_ref[...], preferred_element_type=jnp.float32)
    acc = acc + b_ref[...]
    y = _bn_train(acc, g_ref[...], beta_ref[...], eps)
    o_ref[...] = jnp.maximum(y, 0.0).astype(o_ref.dtype)


def _residual_tail_kernel(w2_ref, p2_ref, b2_ref, g2_ref, beta2_ref,
                          w3_ref, x_ref, b3_ref, o_ref, *, eps):
    """out = relu(BN2(W2 @ P2 + b2) + (W3 @ X + b3))."""
    acc = jnp.dot(w2_ref[...], p2_ref[...], preferred_element_type=jnp.float32)
    acc = acc + b2_ref[...]
    y = _bn_train(acc, g2_ref[...], beta2_ref[...], eps)
    sc = jnp.dot(w3_ref[...], x_ref[...], preferred_element_type=jnp.float32)
    sc = sc + b3_ref[...]
    o_ref[...] = jnp.maximum(y + sc, 0.0).astype(o_ref.dtype)


# ----------------------------------------------------------------------------
# pallas_call wrappers (single grid step, whole arrays as VMEM blocks)
# ----------------------------------------------------------------------------
def _full_spec(shape):
    return pl.BlockSpec(shape, lambda i: (0,) * len(shape))


def _pad_axis(a, axis, mult):
    pad = (-a.shape[axis]) % mult
    if pad == 0:
        return a
    widths = [(0, 0)] * a.ndim
    widths[axis] = (0, pad)
    return jnp.pad(a, widths)


def conv_bn_relu(w2d, patches, bias, gamma, beta):
    """Fused 3x3-conv (as matmul) + bias + BN(batch stats) + ReLU."""
    w2d = _pad_axis(w2d, 1, 8)          # pad K (zero columns, exact)
    patches = _pad_axis(patches, 0, 8)  # pad K (zero rows, exact)
    c, k = w2d.shape
    k2, m = patches.shape
    assert k == k2
    return pl.pallas_call(
        functools.partial(_conv_bn_relu_kernel, eps=BN_EPS),
        out_shape=jax.ShapeDtypeStruct((c, m), jnp.float32),
        grid=(1,),
        in_specs=[_full_spec((c, k)), _full_spec((k, m)),
                  _full_spec((c, 1)), _full_spec((c, 1)), _full_spec((c, 1))],
        out_specs=_full_spec((c, m)),
        compiler_params=pltpu.CompilerParams(
            dimension_semantics=("arbitrary",)),
    )(w2d, patches, bias, gamma, beta)


def residual_tail(w2, patches2, b2, g2, beta2, w3, x_cm, b3):
    """Fused conv2 + bias + BN2 + (1x1 shortcut conv + bias) + add + ReLU."""
    w2 = _pad_axis(w2, 1, 8)
    patches2 = _pad_axis(patches2, 0, 8)
    w3 = _pad_axis(w3, 1, 8)
    x_cm = _pad_axis(x_cm, 0, 8)
    c, k2 = w2.shape
    _, m = patches2.shape
    _, k3 = w3.shape
    return pl.pallas_call(
        functools.partial(_residual_tail_kernel, eps=BN_EPS),
        out_shape=jax.ShapeDtypeStruct((c, m), jnp.float32),
        grid=(1,),
        in_specs=[_full_spec((c, k2)), _full_spec((k2, m)),
                  _full_spec((c, 1)), _full_spec((c, 1)), _full_spec((c, 1)),
                  _full_spec((c, k3)), _full_spec((k3, m)),
                  _full_spec((c, 1))],
        out_specs=_full_spec((c, m)),
        compiler_params=pltpu.CompilerParams(
            dimension_semantics=("arbitrary",)),
    )(w2, patches2, b2, g2, beta2, w3, x_cm, b3)


# ----------------------------------------------------------------------------
# Layout / im2col glue (thin JAX slicing, no heavy HBM traffic at these sizes)
# ----------------------------------------------------------------------------
def to_cm(x_nchw):
    n, c, h, w = x_nchw.shape
    return jnp.transpose(x_nchw, (1, 0, 2, 3)).reshape(c, n * h * w)


def from_cm(x_cm, n, h, w):
    c = x_cm.shape[0]
    return jnp.transpose(x_cm.reshape(c, n, h, w), (1, 0, 2, 3))


def im2col_3x3(x_nchw):
    """3x3 / pad 1 / stride 1 patches as (Cin*9, N*H*W).

    Row order is (cin, ki, kj), matching torch weight.reshape(Cout, Cin*9).
    """
    n, c, h, w = x_nchw.shape
    xp = jnp.pad(x_nchw, ((0, 0), (0, 0), (1, 1), (1, 1)))
    slabs = []
    for ki in range(3):
        for kj in range(3):
            slabs.append(xp[:, :, ki:ki + h, kj:kj + w])   # (N, C, H, W)
    st = jnp.stack(slabs, axis=0)                          # (9, N, C, H, W)
    st = jnp.transpose(st, (2, 0, 1, 3, 4))                # (C, 9, N, H, W)
    return st.reshape(c * 9, n * h * w)


# ----------------------------------------------------------------------------
# Parameters and forward pass
# ----------------------------------------------------------------------------
def init_params(key, c_in, c_out):
    ks = jax.random.split(key, 6)

    def conv_init(kw, kb, co, ci, ksz):
        bound = 1.0 / jnp.sqrt(jnp.float32(ci * ksz * ksz))
        w = jax.random.uniform(kw, (co, ci, ksz, ksz), jnp.float32, -bound, bound)
        b = jax.random.uniform(kb, (co,), jnp.float32, -bound, bound)
        return w, b

    return {
        "conv1": conv_init(ks[0], ks[1], c_out, c_in, 3),
        "conv2": conv_init(ks[2], ks[3], c_out, c_out, 3),
        "conv3": conv_init(ks[4], ks[5], c_out, c_in, 1),
        # PyTorch BatchNorm2d default affine init: gamma=1, beta=0.
        "bn1": (jnp.ones((c_out,), jnp.float32), jnp.zeros((c_out,), jnp.float32)),
        "bn2": (jnp.ones((c_out,), jnp.float32), jnp.zeros((c_out,), jnp.float32)),
    }


def residual_forward(params, x_nchw):
    n, c_in, h, w = x_nchw.shape
    w1, b1 = params["conv1"]
    w2, b2 = params["conv2"]
    w3, b3 = params["conv3"]
    g1, bt1 = params["bn1"]
    g2, bt2 = params["bn2"]
    c_out = w1.shape[0]
    col = lambda v: v.reshape(c_out, 1)

    # Branch 1: relu(bn1(conv1(X)))  — one fused Pallas kernel.
    p1 = im2col_3x3(x_nchw)                                  # (Cin*9, M)
    y1_cm = conv_bn_relu(w1.reshape(c_out, -1), p1,
                         col(b1), col(g1), col(bt1))         # (Cout, M)

    # Tail: relu(bn2(conv2(Y)) + conv3(X))  — one fused Pallas kernel.
    p2 = im2col_3x3(from_cm(y1_cm, n, h, w))                 # (Cout*9, M)
    x_cm = to_cm(x_nchw)                                     # (Cin, M)
    out_cm = residual_tail(w2.reshape(c_out, -1), p2,
                           col(b2), col(g2), col(bt2),
                           w3.reshape(c_out, c_in), x_cm, col(b3))
    return from_cm(out_cm, n, h, w)                          # (N, Cout, H, W)


# ----------------------------------------------------------------------------
# Pure-JAX reference (training-mode BN, NCHW) for a correctness check
# ----------------------------------------------------------------------------
def reference_forward(params, x):
    def conv(x, w, b, pad):
        y = jax.lax.conv_general_dilated(
            x, w, window_strides=(1, 1), padding=[(pad, pad), (pad, pad)],
            dimension_numbers=("NCHW", "OIHW", "NCHW"))
        return y + b[None, :, None, None]

    def bn(x, g, bt):
        mean = jnp.mean(x, axis=(0, 2, 3), keepdims=True)
        var = jnp.mean((x - mean) ** 2, axis=(0, 2, 3), keepdims=True)
        return ((x - mean) / jnp.sqrt(var + BN_EPS)
                * g[None, :, None, None] + bt[None, :, None, None])

    w1, b1 = params["conv1"]
    w2, b2 = params["conv2"]
    w3, b3 = params["conv3"]
    g1, bt1 = params["bn1"]
    g2, bt2 = params["bn2"]
    y = jax.nn.relu(bn(conv(x, w1, b1, 1), g1, bt1))
    y = bn(conv(y, w2, b2, 1), g2, bt2)
    s = conv(x, w3, b3, 0)
    return jax.nn.relu(s + y)


if __name__ == "__main__":
    key = jax.random.PRNGKey(0)
    k_params, k_x = jax.random.split(key)
    c_in, c_out = 4, 8
    params = init_params(k_params, c_in, c_out)
    x = jax.random.normal(k_x, (2, c_in, 16, 16), jnp.float32)

    fwd = jax.jit(residual_forward)
    out = jax.block_until_ready(fwd(params, x))
    assert out.shape == (2, c_out, 16, 16) and out.dtype == jnp.float32

    ref = reference_forward(params, x)
    err = float(jnp.max(jnp.abs(out - ref)))
    assert err < 5e-3, f"mismatch vs reference: max abs err = {err}"
    print("KERNEL_OK")
</pallas_src>

<mosaic_0001>
module attributes {stable_mosaic.version = 11 : i64} {
  func.func @_conv_bn_relu_kernel(%arg0: i32, %arg1: memref<8x40xf32, #tpu.memory_space<vmem>>, %arg2: memref<40x512xf32, #tpu.memory_space<vmem>>, %arg3: memref<8x1xf32, #tpu.memory_space<vmem>>, %arg4: memref<8x1xf32, #tpu.memory_space<vmem>>, %arg5: memref<8x1xf32, #tpu.memory_space<vmem>>, %arg6: memref<8x512xf32, #tpu.memory_space<vmem>>) attributes {dimension_semantics = [#tpu.dimension_semantics<arbitrary>], iteration_bounds = array<i64: 1>, scalar_prefetch = 0 : i64, scratch_operands = 0 : i64, tpu.core_type = #tpu.core_type<tc>, window_params = [{pipeline_mode = #tpu.pipeline_mode<synchronous>, transform_indices = @transform_0, window_bounds = array<i64: 8, 40>}, {pipeline_mode = #tpu.pipeline_mode<synchronous>, transform_indices = @transform_1, window_bounds = array<i64: 40, 512>}, {pipeline_mode = #tpu.pipeline_mode<synchronous>, transform_indices = @transform_2, window_bounds = array<i64: 8, 1>}, {pipeline_mode = #tpu.pipeline_mode<synchronous>, transform_indices = @transform_3, window_bounds = array<i64: 8, 1>}, {pipeline_mode = #tpu.pipeline_mode<synchronous>, transform_indices = @transform_4, window_bounds = array<i64: 8, 1>}, {pipeline_mode = #tpu.pipeline_mode<synchronous>, transform_indices = @transform_5, window_bounds = array<i64: 8, 512>}]} {
    %c0 = arith.constant 0 : index
    %c0_0 = arith.constant 0 : index
    %0 = vector.load %arg1[%c0, %c0_0] : memref<8x40xf32, #tpu.memory_space<vmem>>, vector<8x40xf32>
    %c0_1 = arith.constant 0 : index
    %c0_2 = arith.constant 0 : index
    %1 = vector.load %arg2[%c0_1, %c0_2] : memref<40x512xf32, #tpu.memory_space<vmem>>, vector<40x512xf32>
    %cst = arith.constant dense<0.000000e+00> : vector<8x512xf32>
    %2 = tpu.matmul %0, %1, %cst {dimension_numbers = #tpu.dot_dimension_numbers<[1], [0], [0], [1], [0, 0, 1, 1], [], []>} : vector<8x40xf32>, vector<40x512xf32>, vector<8x512xf32> -> vector<8x512xf32>
    %c0_3 = arith.constant 0 : index
    %c0_4 = arith.constant 0 : index
    %3 = vector.load %arg3[%c0_3, %c0_4] : memref<8x1xf32, #tpu.memory_space<vmem>>, vector<8x1xf32>
    %4 = vector.broadcast %3 : vector<8x1xf32> to vector<8x512xf32>
    %5 = arith.addf %2, %4 : vector<8x512xf32>
    %c0_5 = arith.constant 0 : index
    %c0_6 = arith.constant 0 : index
    %6 = vector.load %arg4[%c0_5, %c0_6] : memref<8x1xf32, #tpu.memory_space<vmem>>, vector<8x1xf32>
    %c0_7 = arith.constant 0 : index
    %c0_8 = arith.constant 0 : index
    %7 = vector.load %arg5[%c0_7, %c0_8] : memref<8x1xf32, #tpu.memory_space<vmem>>, vector<8x1xf32>
    %cst_9 = arith.constant dense<0.000000e+00> : vector<8xf32>
    %8 = vector.multi_reduction <add>, %5, %cst_9 [1] : vector<8x512xf32> to vector<8xf32>
    %9 = vector.shape_cast %8 : vector<8xf32> to vector<8x1xf32>
    %cst_10 = arith.constant 5.120000e+02 : f32
    %10 = vector.broadcast %cst_10 : f32 to vector<8x1xf32>
    %11 = arith.divf %9, %10 : vector<8x1xf32>
    %12 = vector.broadcast %11 : vector<8x1xf32> to vector<8x512xf32>
    %13 = arith.subf %5, %12 : vector<8x512xf32>
    %14 = arith.mulf %13, %13 : vector<8x512xf32>
    %cst_11 = arith.constant dense<0.000000e+00> : vector<8xf32>
    %15 = vector.multi_reduction <add>, %14, %cst_11 [1] : vector<8x512xf32> to vector<8xf32>
    %16 = vector.shape_cast %15 : vector<8xf32> to vector<8x1xf32>
    %cst_12 = arith.constant 5.120000e+02 : f32
    %17 = vector.broadcast %cst_12 : f32 to vector<8x1xf32>
    %18 = arith.divf %16, %17 : vector<8x1xf32>
    %cst_13 = arith.constant 9.99999974E-6 : f32
    %19 = vector.broadcast %cst_13 : f32 to vector<8x1xf32>
    %20 = arith.addf %18, %19 : vector<8x1xf32>
    %21 = math.rsqrt %20 : vector<8x1xf32>
    %22 = arith.mulf %6, %21 : vector<8x1xf32>
    %23 = vector.broadcast %22 : vector<8x1xf32> to vector<8x512xf32>
    %24 = arith.mulf %13, %23 : vector<8x512xf32>
    %25 = vector.broadcast %7 : vector<8x1xf32> to vector<8x512xf32>
    %26 = arith.addf %24, %25 : vector<8x512xf32>
    %cst_14 = arith.constant 0.000000e+00 : f32
    %27 = vector.broadcast %cst_14 : f32 to vector<8x512xf32>
    %28 = arith.maximumf %26, %27 : vector<8x512xf32>
    %c0_15 = arith.constant 0 : index
    %c0_16 = arith.constant 0 : index
    %29 = vector.load %arg6[%c0_15, %c0_16] : memref<8x512xf32, #tpu.memory_space<vmem>>, vector<8x512xf32>
    tpu.vector_store %arg6[%c0_15, %c0_16], %28 {strides = array<i32>} : memref<8x512xf32, #tpu.memory_space<vmem>>, vector<8x512xf32>,
    return
  }
  func.func @transform_0(%arg0: i32) -> (i32, i32) {
    %c0_i32 = arith.constant 0 : i32
    %c0_i32_0 = arith.constant 0 : i32
    %c0_i32_1 = arith.constant 0 : i32
    return %c0_i32, %c0_i32_0 : i32, i32
  }
  func.func @transform_1(%arg0: i32) -> (i32, i32) {
    %c0_i32 = arith.constant 0 : i32
    %c0_i32_0 = arith.constant 0 : i32
    %c0_i32_1 = arith.constant 0 : i32
    return %c0_i32, %c0_i32_0 : i32, i32
  }
  func.func @transform_2(%arg0: i32) -> (i32, i32) {
    %c0_i32 = arith.constant 0 : i32
    %c0_i32_0 = arith.constant 0 : i32
    %c0_i32_1 = arith.constant 0 : i32
    return %c0_i32, %c0_i32_0 : i32, i32
  }
  func.func @transform_3(%arg0: i32) -> (i32, i32) {
    %c0_i32 = arith.constant 0 : i32
    %c0_i32_0 = arith.constant 0 : i32
    %c0_i32_1 = arith.constant 0 : i32
    return %c0_i32, %c0_i32_0 : i32, i32
  }
  func.func @transform_4(%arg0: i32) -> (i32, i32) {
    %c0_i32 = arith.constant 0 : i32
    %c0_i32_0 = arith.constant 0 : i32
    %c0_i32_1 = arith.constant 0 : i32
    return %c0_i32, %c0_i32_0 : i32, i32
  }
  func.func @transform_5(%arg0: i32) -> (i32, i32) {
    %c0_i32 = arith.constant 0 : i32
    %c0_i32_0 = arith.constant 0 : i32
    %c0_i32_1 = arith.constant 0 : i32
    return %c0_i32, %c0_i32_0 : i32, i32
  }
}

module attributes {stable_mosaic.version = 11 : i64} {
  func.func @_residual_tail_kernel(%arg0: i32, %arg1: memref<8x72xf32, #tpu.memory_space<vmem>>, %arg2: memref<72x512xf32, #tpu.memory_space<vmem>>, %arg3: memref<8x1xf32, #tpu.memory_space<vmem>>, %arg4: memref<8x1xf32, #tpu.memory_space<vmem>>, %arg5: memref<8x1xf32, #tpu.memory_space<vmem>>, %arg6: memref<8x8xf32, #tpu.memory_space<vmem>>, %arg7: memref<8x512xf32, #tpu.memory_space<vmem>>, %arg8: memref<8x1xf32, #tpu.memory_space<vmem>>, %arg9: memref<8x512xf32, #tpu.memory_space<vmem>>) attributes {dimension_semantics = [#tpu.dimension_semantics<arbitrary>], iteration_bounds = array<i64: 1>, scalar_prefetch = 0 : i64, scratch_operands = 0 : i64, tpu.core_type = #tpu.core_type<tc>, window_params = [{pipeline_mode = #tpu.pipeline_mode<synchronous>, transform_indices = @transform_0, window_bounds = array<i64: 8, 72>}, {pipeline_mode = #tpu.pipeline_mode<synchronous>, transform_indices = @transform_1, window_bounds = array<i64: 72, 512>}, {pipeline_mode = #tpu.pipeline_mode<synchronous>, transform_indices = @transform_2, window_bounds = array<i64: 8, 1>}, {pipeline_mode = #tpu.pipeline_mode<synchronous>, transform_indices = @transform_3, window_bounds = array<i64: 8, 1>}, {pipeline_mode = #tpu.pipeline_mode<synchronous>, transform_indices = @transform_4, window_bounds = array<i64: 8, 1>}, {pipeline_mode = #tpu.pipeline_mode<synchronous>, transform_indices = @transform_5, window_bounds = array<i64: 8, 8>}, {pipeline_mode = #tpu.pipeline_mode<synchronous>, transform_indices = @transform_6, window_bounds = array<i64: 8, 512>}, {pipeline_mode = #tpu.pipeline_mode<synchronous>, transform_indices = @transform_7, window_bounds = array<i64: 8, 1>}, {pipeline_mode = #tpu.pipeline_mode<synchronous>, transform_indices = @transform_8, window_bounds = array<i64: 8, 512>}]} {
    %c0 = arith.constant 0 : index
    %c0_0 = arith.constant 0 : index
    %0 = vector.load %arg1[%c0, %c0_0] : memref<8x72xf32, #tpu.memory_space<vmem>>, vector<8x72xf32>
    %c0_1 = arith.constant 0 : index
    %c0_2 = arith.constant 0 : index
    %1 = vector.load %arg2[%c0_1, %c0_2] : memref<72x512xf32, #tpu.memory_space<vmem>>, vector<72x512xf32>
    %cst = arith.constant dense<0.000000e+00> : vector<8x512xf32>
    %2 = tpu.matmul %0, %1, %cst {dimension_numbers = #tpu.dot_dimension_numbers<[1], [0], [0], [1], [0, 0, 1, 1], [], []>} : vector<8x72xf32>, vector<72x512xf32>, vector<8x512xf32> -> vector<8x512xf32>
    %c0_3 = arith.constant 0 : index
    %c0_4 = arith.constant 0 : index
    %3 = vector.load %arg3[%c0_3, %c0_4] : memref<8x1xf32, #tpu.memory_space<vmem>>, vector<8x1xf32>
    %4 = vector.broadcast %3 : vector<8x1xf32> to vector<8x512xf32>
    %5 = arith.addf %2, %4 : vector<8x512xf32>
    %c0_5 = arith.constant 0 : index
    %c0_6 = arith.constant 0 : index
    %6 = vector.load %arg4[%c0_5, %c0_6] : memref<8x1xf32, #tpu.memory_space<vmem>>, vector<8x1xf32>
    %c0_7 = arith.constant 0 : index
    %c0_8 = arith.constant 0 : index
    %7 = vector.load %arg5[%c0_7, %c0_8] : memref<8x1xf32, #tpu.memory_space<vmem>>, vector<8x1xf32>
    %cst_9 = arith.constant dense<0.000000e+00> : vector<8xf32>
    %8 = vector.multi_reduction <add>, %5, %cst_9 [1] : vector<8x512xf32> to vector<8xf32>
    %9 = vector.shape_cast %8 : vector<8xf32> to vector<8x1xf32>
    %cst_10 = arith.constant 5.120000e+02 : f32
    %10 = vector.broadcast %cst_10 : f32 to vector<8x1xf32>
    %11 = arith.divf %9, %10 : vector<8x1xf32>
    %12 = vector.broadcast %11 : vector<8x1xf32> to vector<8x512xf32>
    %13 = arith.subf %5, %12 : vector<8x512xf32>
    %14 = arith.mulf %13, %13 : vector<8x512xf32>
    %cst_11 = arith.constant dense<0.000000e+00> : vector<8xf32>
    %15 = vector.multi_reduction <add>, %14, %cst_11 [1] : vector<8x512xf32> to vector<8xf32>
    %16 = vector.shape_cast %15 : vector<8xf32> to vector<8x1xf32>
    %cst_12 = arith.constant 5.120000e+02 : f32
    %17 = vector.broadcast %cst_12 : f32 to vector<8x1xf32>
    %18 = arith.divf %16, %17 : vector<8x1xf32>
    %cst_13 = arith.constant 9.99999974E-6 : f32
    %19 = vector.broadcast %cst_13 : f32 to vector<8x1xf32>
    %20 = arith.addf %18, %19 : vector<8x1xf32>
    %21 = math.rsqrt %20 : vector<8x1xf32>
    %22 = arith.mulf %6, %21 : vector<8x1xf32>
    %23 = vector.broadcast %22 : vector<8x1xf32> to vector<8x512xf32>
    %24 = arith.mulf %13, %23 : vector<8x512xf32>
    %25 = vector.broadcast %7 : vector<8x1xf32> to vector<8x512xf32>
    %26 = arith.addf %24, %25 : vector<8x512xf32>
    %c0_14 = arith.constant 0 : index
    %c0_15 = arith.constant 0 : index
    %27 = vector.load %arg6[%c0_14, %c0_15] : memref<8x8xf32, #tpu.memory_space<vmem>>, vector<8x8xf32>
    %c0_16 = arith.constant 0 : index
    %c0_17 = arith.constant 0 : index
    %28 = vector.load %arg7[%c0_16, %c0_17] : memref<8x512xf32, #tpu.memory_space<vmem>>, vector<8x512xf32>
    %cst_18 = arith.constant dense<0.000000e+00> : vector<8x512xf32>
    %29 = tpu.matmul %27, %28, %cst_18 {dimension_numbers = #tpu.dot_dimension_numbers<[1], [0], [0], [1], [0, 0, 1, 1], [], []>} : vector<8x8xf32>, vector<8x512xf32>, vector<8x512xf32> -> vector<8x512xf32>
    %c0_19 = arith.constant 0 : index
    %c0_20 = arith.constant 0 : index
    %30 = vector.load %arg8[%c0_19, %c0_20] : memref<8x1xf32, #tpu.memory_space<vmem>>, vector<8x1xf32>
    %31 = vector.broadcast %30 : vector<8x1xf32> to vector<8x512xf32>
    %32 = arith.addf %29, %31 : vector<8x512xf32>
    %33 = arith.addf %26, %32 : vector<8x512xf32>
    %cst_21 = arith.constant 0.000000e+00 : f32
    %34 = vector.broadcast %cst_21 : f32 to vector<8x512xf32>
    %35 = arith.maximumf %33, %34 : vector<8x512xf32>
    %c0_22 = arith.constant 0 : index
    %c0_23 = arith.constant 0 : index
    %36 = vector.load %arg9[%c0_22, %c0_23] : memref<8x512xf32, #tpu.memory_space<vmem>>, vector<8x512xf32>
    tpu.vector_store %arg9[%c0_22, %c0_23], %35 {strides = array<i32>} : memref<8x512xf32, #tpu.memory_space<vmem>>, vector<8x512xf32>,
    return
  }
  func.func @transform_0(%arg0: i32) -> (i32, i32) {
    %c0_i32 = arith.constant 0 : i32
    %c0_i32_0 = arith.constant 0 : i32
    %c0_i32_1 = arith.constant 0 : i32
    return %c0_i32, %c0_i32_0 : i32, i32
  }
  func.func @transform_1(%arg0: i32) -> (i32, i32) {
    %c0_i32 = arith.constant 0 : i32
    %c0_i32_0 = arith.constant 0 : i32
    %c0_i32_1 = arith.constant 0 : i32
    return %c0_i32, %c0_i32_0 : i32, i32
  }
  func.func @transform_2(%arg0: i32) -> (i32, i32) {
    %c0_i32 = arith.constant 0 : i32
    %c0_i32_0 = arith.constant 0 : i32
    %c0_i32_1 = arith.constant 0 : i32
    return %c0_i32, %c0_i32_0 : i32, i32
  }
  func.func @transform_3(%arg0: i32) -> (i32, i32) {
    %c0_i32 = arith.constant 0 : i32
    %c0_i32_0 = arith.constant 0 : i32
    %c0_i32_1 = arith.constant 0 : i32
    return %c0_i32, %c0_i32_0 : i32, i32
  }
  func.func @transform_4(%arg0: i32) -> (i32, i32) {
    %c0_i32 = arith.constant 0 : i32
    %c0_i32_0 = arith.constant 0 : i32
    %c0_i32_1 = arith.constant 0 : i32
    return %c0_i32, %c0_i32_0 : i32, i32
  }
  func.func @transform_5(%arg0: i32) -> (i32, i32) {
    %c0_i32 = arith.constant 0 : i32
    %c0_i32_0 = arith.constant 0 : i32
    %c0_i32_1 = arith.constant 0 : i32
    return %c0_i32, %c0_i32_0 : i32, i32
  }
  func.func @transform_6(%arg0: i32) -> (i32, i32) {
    %c0_i32 = arith.constant 0 : i32
    %c0_i32_0 = arith.constant 0 : i32
    %c0_i32_1 = arith.constant 0 : i32
    return %c0_i32, %c0_i32_0 : i32, i32
  }
  func.func @transform_7(%arg0: i32) -> (i32, i32) {
    %c0_i32 = arith.constant 0 : i32
    %c0_i32_0 = arith.constant 0 : i32
    %c0_i32_1 = arith.constant 0 : i32
    return %c0_i32, %c0_i32_0 : i32, i32
  }
  func.func @transform_8(%arg0: i32) -> (i32, i32) {
    %c0_i32 = arith.constant 0 : i32
    %c0_i32_0 = arith.constant 0 : i32
    %c0_i32_1 = arith.constant 0 : i32
    return %c0_i32, %c0_i32_0 : i32, i32
  }
}

</mosaic_0001>

<bundles_post_ra>
// kernel: residual_forward.2
= control target key start
LH: loop header
LB: loop body
LE: loop exit
PB: predicated region body
PF: predicated region fallthrough
CT: control target
= control target key end

     0   :  { %v215_v3 = vmov 0   ;;  %vm47_vm0 = vcmask 326656   ;;  %v216_v35 = vmov 512.0   ;;  %s331_s1 = inlined_call_operand.vmem [shape: f32[40,512], index: 1, kind: input, shape index: {}]   ;;  %s332_s0 = inlined_call_operand.vmem [shape: f32[8,40], index: 0, kind: input, shape index: {}]   ;;  %s333_s2 = inlined_call_operand.vmem [shape: f32[8,1], index: 2, kind: input, shape index: {}]   ;;  %s334_s4 = inlined_call_operand.vmem [shape: f32[8,1], index: 4, kind: input, shape index: {}]   ;;  %s335_s3 = inlined_call_operand.vmem [shape: f32[8,1], index: 3, kind: input, shape index: {}]   ;;  %s336_s5 = inlined_call_operand.vmem [shape: f32[8,512], index: 5, kind: output, shape index: {}]  }
   0x1   :  { %v39_v0 = vld [vmem:[%s331_s1 + $0x90] sm:$0xff]  ;;  %v40_v1 = vld [vmem:[%s331_s1 + $0x98] sm:$0xff]  ;;  %208 = vset.pattern.permute.xlu0 %v215_v3  ;;  %209 = vset.pattern.permute.xlu1 %v215_v3  ;;  %v37_v5 = vld [vmem:[%s331_s1 + $0x80] sm:$0xff]  ;;  %211 = vrcp.f32 %v216_v35 }
   0x2   :  { %v35_v2 = vld [vmem:[%s331_s1 + $0x70] sm:$0xff]  ;;  %102 = vmatpush.msra.mxu2 %v39_v0  ;;  %122 = vmatpush.msra.mxu3 %v40_v1  ;;  %v36_v4 = vld [vmem:[%s331_s1 + $0x78] sm:$0xff]  ;;  %v38_v6 = vld [vmem:[%s331_s1 + $0x88] sm:$0xff] }
   0x3   :  { %62 = vmatpush.msra.mxu0 %v37_v5  ;;  %82 = vmatpush.msra.mxu1 %v38_v6  ;;  %v31_v7 = vld [vmem:[%s331_s1 + $0x50] sm:$0xff]  ;;  %v32_v8 = vld [vmem:[%s331_s1 + $0x58] sm:$0xff]  ;;  %v33_v9 = vld [vmem:[%s331_s1 + $0x60] sm:$0xff] }
   0x4   :  { %103 = vmatpush.msra.mxu2 %v35_v2  ;;  %123 = vmatpush.msra.mxu3 %v36_v4  ;;  %v34_v10 = vld [vmem:[%s331_s1 + $0x68] sm:$0xff]  ;;  %v27_v11 = vld [vmem:[%s331_s1 + $0x30] sm:$0xff]  ;;  %v28_v12 = vld [vmem:[%s331_s1 + $0x38] sm:$0xff] }
   0x5   :  { %63 = vmatpush.msra.mxu0 %v33_v9  ;;  %83 = vmatpush.msra.mxu1 %v34_v10  ;;  %v29_v13 = vld [vmem:[%s331_s1 + $0x40] sm:$0xff]  ;;  %v30_v14 = vld [vmem:[%s331_s1 + $0x48] sm:$0xff]  ;;  %v23_v16 = vld [vmem:[%s331_s1 + $0x10] sm:$0xff] }
   0x6   :  { %104 = vmatpush.msra.mxu2 %v31_v7  ;;  %124 = vmatpush.msra.mxu3 %v32_v8  ;;  %v25_v15 = vld [vmem:[%s331_s1 + $0x20] sm:$0xff]  ;;  %v24_v17 = vld [vmem:[%s331_s1 + $0x18] sm:$0xff]  ;;  %v26_v18 = vld [vmem:[%s331_s1 + $0x28] sm:$0xff] }
   0x7   :  { %64 = vmatpush.msra.mxu0 %v29_v13  ;;  %84 = vmatpush.msra.mxu1 %v30_v14  ;;  %v20_v19 = vld [vmem:[%s332_s0] sm:$0xff]  ;;  %v22_v21 = vld [vmem:[%s331_s1 + $0x8] sm:$0xff]  ;;  %v212_v36 = vpop.eup %211 }
   0x8   :  { %105 = vmatpush.msra.mxu2 %v27_v11  ;;  %125 = vmatpush.msra.mxu3 %v28_v12  ;;  %v21_v20 = vld [vmem:[%s331_s1] sm:$0xff]  ;;  %v139_v37 = vmul.f32 512.0, %v212_v36  ;;  %vm143_vm1 = vweird.f32 %v212_v36 }
   0x9   :  { %65 = vmatpush.msra.mxu0 %v25_v15  ;;  %85 = vmatpush.msra.mxu1 %v26_v18  ;;  %v41_v22 = vld [vmem:[%s333_s2] sm:$0xff] }
   0xa   :  { %106 = vmatpush.msra.mxu2 %v23_v16  ;;  %126 = vmatpush.msra.mxu3 %v24_v17  ;;  %v140_v38 = vsub.f32 1.0, %v139_v37  ;;  %v132_v55 = vld [vmem:[%s334_s4] sm:$0xff] }
   0xb   :  { %204 = vmatmul.msk.f32.vlgmr.msra.gmra.mxu2 %vm47_vm0, %v20_v19  ;;  %205 = vmatmul.msk.f32.vlgmr.msra.gmra.mxu3 %vm47_vm0, %v20_v19  ;;  %v131_v0 = vld [vmem:[%s335_s3] sm:$0xff] }
   0xc   :  { %66 = vmatpush.msra.mxu0 %v21_v20  ;;  %86 = vmatpush.msra.mxu1 %v22_v21  ;;  %v141_v39 = vmul.f32 %v212_v36, %v140_v38 }
   0xd   :  { %202 = vmatmul.msk.f32.vlgmr.msra.gmra.mxu0 %vm47_vm0, %v20_v19  ;;  %203 = vmatmul.msk.f32.vlgmr.msra.gmra.mxu1 %vm47_vm0, %v20_v19 }
   0xe   :  { %44 = vperm.xlu0 %208, %v41_v22   ;;  %210 = vset.pattern.permute.xlu2 %v215_v3  ;;  %v142_v40 = vadd.f32 %v212_v36, %v141_v39 }
   0xf   :  { %183 = vperm.xlu2 %210, %v132_v55  }
  0x10   :  { %v144_v41 = vsel %vm143_vm1, %v212_v36, %v142_v40 }
  0x69   :  { %v184_v5 = vpop.permute.xlu2 %183 }
  0x80   :  { %v45_v23 = vpop.permute.xlu0 %44 }
  0x8a   :  { %v68_v24 = vpop.f32.mrf.mxu0  ;;  %v88_v25 = vpop.f32.mrf.mxu1 }
  0x8b   :  { %v69_v26 = vadd.f32 %v68_v24, %v45_v23  ;;  %v89_v27 = vadd.f32 %v88_v25, %v45_v23 }
  0x8d   :  { %v133_v28 = vadd.f32 %v89_v27, %v69_v26 }
  0x8e   :  { %v108_v29 = vpop.f32.mrf.mxu2  ;;  %v128_v30 = vpop.f32.mrf.mxu3 }
  0x8f   :  { %v109_v31 = vadd.f32 %v108_v29, %v45_v23  ;;  %v129_v33 = vadd.f32 %v128_v30, %v45_v23 }
  0x91   :  { %v134_v32 = vadd.f32 %v133_v28, %v109_v31 }
  0x93   :  { %v135_v34 = vadd.f32 %v134_v32, %v129_v33 }
  0x95   :  { %136 = vadd.xlane.f32.xlu0 %v135_v34 }
 0x108   :  { %v137_v42 = vpop.xlane.xlu0 %136 }
 0x109   :  { %v145_v43 = vmul.f32 %v144_v41, %v137_v42 }
 0x10b   :  { %v146_v44 = vsub.f32 %v69_v26, %v145_v43  ;;  %v147_v45 = vsub.f32 %v89_v27, %v145_v43  ;;  %v148_v46 = vsub.f32 %v109_v31, %v145_v43  ;;  %v149_v47 = vsub.f32 %v129_v33, %v145_v43 }
 0x10d   :  { %v150_v48 = vmul.f32 %v146_v44, %v146_v44  ;;  %v151_v49 = vmul.f32 %v147_v45, %v147_v45  ;;  %v152_v50 = vmul.f32 %v148_v46, %v148_v46  ;;  %v153_v52 = vmul.f32 %v149_v47, %v149_v47 }
 0x10f   :  { %v154_v51 = vadd.f32 %v151_v49, %v150_v48 }
 0x111   :  { %v155_v53 = vadd.f32 %v154_v51, %v152_v50 }
 0x113   :  { %v156_v54 = vadd.f32 %v155_v53, %v153_v52 }
 0x115   :  { %157 = vadd.xlane.f32.xlu1 %v156_v54 }
 0x188   :  { %v158_v56 = vpop.xlane.xlu1 %157 }
 0x189   :  { %v159_v57 = vmul.f32 %v158_v56, %v144_v41 }
 0x18b   :  { %v160_v58 = vadd.f32 1e-05, %v159_v57 }
 0x18d   :  { %213 = vrsqrt.f32 %v160_v58  ;;  %vm167_vm3 = vweird.f32 %v160_v58 }
 0x193   :  { %v214_v59 = vpop.eup %213 }
 0x194   :  { %v162_v60 = vmul.f32 %v214_v59, %v160_v58  ;;  %vm168_vm2 = vweird.f32 %v214_v59 }
 0x195   :  { %vm169_vm4 = vmor %vm167_vm3, %vm168_vm2 }
 0x196   :  { %v163_v61 = vmul.f32 %v214_v59, %v162_v60 }
 0x198   :  { %v164_v62 = vmul.f32 0.5, %v163_v61 }
 0x19a   :  { %v165_v63 = vsub.f32 1.5, %v164_v62 }
 0x19c   :  { %v166_v1 = vmul.f32 %v214_v59, %v165_v63 }
 0x19e   :  { %v170_v2 = vsel %vm169_vm4, %v214_v59, %v166_v1 }
 0x19f   :  { %v171_v3 = vmul.f32 %v170_v2, %v131_v0 }
 0x1a1   :  { %174 = vperm.xlu1 %209, %v171_v3  }
 0x213   :  { %v175_v4 = vpop.permute.xlu1 %174 }
 0x214   :  { %v177_v6 = vmul.f32 %v175_v4, %v146_v44  ;;  %v178_v7 = vmul.f32 %v175_v4, %v147_v45  ;;  %v179_v8 = vmul.f32 %v175_v4, %v148_v46  ;;  %v180_v9 = vmul.f32 %v175_v4, %v149_v47 }
 0x216   :  { %v186_v10 = vadd.f32 %v184_v5, %v177_v6  ;;  %v187_v11 = vadd.f32 %v184_v5, %v178_v7  ;;  %v188_v12 = vadd.f32 %v184_v5, %v179_v8  ;;  %v189_v13 = vadd.f32 %v184_v5, %v180_v9 }
 0x218   :  { %v190_v14 = vmax.f32 %v186_v10, 0.0  ;;  %v191_v15 = vmax.f32 %v187_v11, 0.0  ;;  %v192_v16 = vmax.f32 %v188_v12, 0.0  ;;  %v193_v17 = vmax.f32 %v189_v13, 0.0 }
 0x21a   :  { %194 = vst [vmem:[%s336_s5] sm:$0xff] %v190_v14 }
 0x21b   :  { %195 = vst [vmem:[%s336_s5 + $0x8] sm:$0xff] %v191_v15 }
 0x21c   :  { %196 = vst [vmem:[%s336_s5 + $0x10] sm:$0xff] %v192_v16 }
 0x21d   :  { %197 = vst [vmem:[%s336_s5 + $0x18] sm:$0xff] %v193_v17 }

// kernel: residual_forward.3
= control target key start
LH: loop header
LB: loop body
LE: loop exit
PB: predicated region body
PF: predicated region fallthrough
CT: control target
= control target key end

     0   :  { %v343_v3 = vmov 0   ;;  %vm72_vm0 = vcmask 588800   ;;  %v344_v51 = vmov 512.0   ;;  %vm226_vm2 = vcmask 64512   ;;  %s543_s1 = inlined_call_operand.vmem [shape: f32[72,512], index: 1, kind: input, shape index: {}]   ;;  %s544_s0 = inlined_call_operand.vmem [shape: f32[8,72], index: 0, kind: input, shape index: {}]   ;;  %s545_s2 = inlined_call_operand.vmem [shape: f32[8,1], index: 2, kind: input, shape index: {}]   ;;  %s546_s6 = inlined_call_operand.vmem [shape: f32[8,512], index: 6, kind: input, shape index: {}]   ;;  %s547_s5 = inlined_call_operand.vmem [shape: f32[8,8], index: 5, kind: input, shape index: {}]   ;;  %s548_s4 = inlined_call_operand.vmem [shape: f32[8,1], index: 4, kind: input, shape index: {}]   ;;  %s549_s7 = inlined_call_operand.vmem [shape: f32[8,1], index: 7, kind: input, shape index: {}]   ;;  %s550_s3 = inlined_call_operand.vmem [shape: f32[8,1], index: 3, kind: input, shape index: {}]   ;;  %s551_s8 = inlined_call_operand.vmem [shape: f32[8,512], index: 8, kind: output, shape index: {}]  }
   0x1   :  { %v64_v0 = vld [vmem:[%s543_s1 + $0x110] sm:$0xff]  ;;  %v65_v1 = vld [vmem:[%s543_s1 + $0x118] sm:$0xff]  ;;  %336 = vset.pattern.permute.xlu0 %v343_v3  ;;  %337 = vset.pattern.permute.xlu1 %v343_v3  ;;  %v62_v5 = vld [vmem:[%s543_s1 + $0x100] sm:$0xff]  ;;  %339 = vrcp.f32 %v344_v51 }
   0x2   :  { %v60_v2 = vld [vmem:[%s543_s1 + $0xf0] sm:$0xff]  ;;  %123 = vmatpush.msra.mxu2 %v64_v0  ;;  %143 = vmatpush.msra.mxu3 %v65_v1  ;;  %v61_v4 = vld [vmem:[%s543_s1 + $0xf8] sm:$0xff]  ;;  %v63_v6 = vld [vmem:[%s543_s1 + $0x108] sm:$0xff] }
   0x3   :  { %83 = vmatpush.msra.mxu0 %v62_v5  ;;  %103 = vmatpush.msra.mxu1 %v63_v6  ;;  %v56_v7 = vld [vmem:[%s543_s1 + $0xd0] sm:$0xff]  ;;  %v57_v8 = vld [vmem:[%s543_s1 + $0xd8] sm:$0xff]  ;;  %v58_v9 = vld [vmem:[%s543_s1 + $0xe0] sm:$0xff] }
   0x4   :  { %124 = vmatpush.msra.mxu2 %v60_v2  ;;  %144 = vmatpush.msra.mxu3 %v61_v4  ;;  %v59_v10 = vld [vmem:[%s543_s1 + $0xe8] sm:$0xff]  ;;  %v52_v11 = vld [vmem:[%s543_s1 + $0xb0] sm:$0xff]  ;;  %v53_v12 = vld [vmem:[%s543_s1 + $0xb8] sm:$0xff] }
   0x5   :  { %84 = vmatpush.msra.mxu0 %v58_v9  ;;  %104 = vmatpush.msra.mxu1 %v59_v10  ;;  %v54_v13 = vld [vmem:[%s543_s1 + $0xc0] sm:$0xff]  ;;  %v55_v14 = vld [vmem:[%s543_s1 + $0xc8] sm:$0xff]  ;;  %v48_v17 = vld [vmem:[%s543_s1 + $0x90] sm:$0xff] }
   0x6   :  { %125 = vmatpush.msra.mxu2 %v56_v7  ;;  %145 = vmatpush.msra.mxu3 %v57_v8  ;;  %v50_v15 = vld [vmem:[%s543_s1 + $0xa0] sm:$0xff]  ;;  %v51_v16 = vld [vmem:[%s543_s1 + $0xa8] sm:$0xff]  ;;  %v49_v18 = vld [vmem:[%s543_s1 + $0x98] sm:$0xff] }
   0x7   :  { %85 = vmatpush.msra.mxu0 %v54_v13  ;;  %105 = vmatpush.msra.mxu1 %v55_v14  ;;  %v46_v19 = vld [vmem:[%s543_s1 + $0x80] sm:$0xff]  ;;  %v47_v20 = vld [vmem:[%s543_s1 + $0x88] sm:$0xff]  ;;  %v44_v21 = vld [vmem:[%s543_s1 + $0x70] sm:$0xff]  ;;  %v340_v52 = vpop.eup %339 }
   0x8   :  { %126 = vmatpush.msra.mxu2 %v52_v11  ;;  %146 = vmatpush.msra.mxu3 %v53_v12  ;;  %v45_v22 = vld [vmem:[%s543_s1 + $0x78] sm:$0xff]  ;;  %v42_v23 = vld [vmem:[%s543_s1 + $0x60] sm:$0xff]  ;;  %v43_v24 = vld [vmem:[%s543_s1 + $0x68] sm:$0xff]  ;;  %v164_v53 = vmul.f32 512.0, %v340_v52  ;;  %vm168_vm1 = vweird.f32 %v340_v52 }
   0x9   :  { %86 = vmatpush.msra.mxu0 %v50_v15  ;;  %106 = vmatpush.msra.mxu1 %v51_v16  ;;  %v40_v25 = vld [vmem:[%s543_s1 + $0x50] sm:$0xff]  ;;  %v41_v26 = vld [vmem:[%s543_s1 + $0x58] sm:$0xff]  ;;  %v38_v27 = vld [vmem:[%s543_s1 + $0x40] sm:$0xff] }
   0xa   :  { %127 = vmatpush.msra.mxu2 %v48_v17  ;;  %147 = vmatpush.msra.mxu3 %v49_v18  ;;  %v39_v28 = vld [vmem:[%s543_s1 + $0x48] sm:$0xff]  ;;  %v36_v29 = vld [vmem:[%s543_s1 + $0x30] sm:$0xff]  ;;  %v37_v30 = vld [vmem:[%s543_s1 + $0x38] sm:$0xff]  ;;  %v165_v54 = vsub.f32 1.0, %v164_v53 }
   0xb   :  { %87 = vmatpush.msra.mxu0 %v46_v19  ;;  %107 = vmatpush.msra.mxu1 %v47_v20  ;;  %v34_v31 = vld [vmem:[%s543_s1 + $0x20] sm:$0xff]  ;;  %v35_v32 = vld [vmem:[%s543_s1 + $0x28] sm:$0xff]  ;;  %v32_v33 = vld [vmem:[%s543_s1 + $0x10] sm:$0xff] }
   0xc   :  { %128 = vmatpush.msra.mxu2 %v44_v21  ;;  %148 = vmatpush.msra.mxu3 %v45_v22  ;;  %v33_v34 = vld [vmem:[%s543_s1 + $0x18] sm:$0xff]  ;;  %v29_v35 = vld [vmem:[%s544_s0] sm:$0xff]  ;;  %v31_v37 = vld [vmem:[%s543_s1 + $0x8] sm:$0xff]  ;;  %v166_v55 = vmul.f32 %v340_v52, %v165_v54 }
   0xd   :  { %88 = vmatpush.msra.mxu0 %v42_v23  ;;  %108 = vmatpush.msra.mxu1 %v43_v24  ;;  %v30_v36 = vld [vmem:[%s543_s1] sm:$0xff]  ;;  %v218_v7 = vld [vmem:[%s546_s6 + $0x10] sm:$0xff]  ;;  %v219_v8 = vld [vmem:[%s546_s6 + $0x18] sm:$0xff] }
   0xe   :  { %129 = vmatpush.msra.mxu2 %v40_v25  ;;  %149 = vmatpush.msra.mxu3 %v41_v26  ;;  %v66_v38 = vld [vmem:[%s545_s2] sm:$0xff]  ;;  %v167_v56 = vadd.f32 %v340_v52, %v166_v55  ;;  %v217_v11 = vld [vmem:[%s546_s6 + $0x8] sm:$0xff] }
   0xf   :  { %89 = vmatpush.msra.mxu0 %v38_v27  ;;  %109 = vmatpush.msra.mxu1 %v39_v28  ;;  %v215_v9 = vld [vmem:[%s547_s5] sm:$0xff] }
  0x10   :  { %130 = vmatpush.msra.mxu2 %v36_v29  ;;  %150 = vmatpush.msra.mxu3 %v37_v30  ;;  %v169_v57 = vsel %vm168_vm1, %v340_v52, %v167_v56  ;;  %v216_v10 = vld [vmem:[%s546_s6] sm:$0xff] }
  0x11   :  { %90 = vmatpush.msra.mxu0 %v34_v31  ;;  %110 = vmatpush.msra.mxu1 %v35_v32  ;;  %v157_v12 = vld [vmem:[%s548_s4] sm:$0xff] }
  0x12   :  { %131 = vmatpush.msra.mxu2 %v32_v33  ;;  %151 = vmatpush.msra.mxu3 %v33_v34  ;;  %v220_v13 = vld [vmem:[%s549_s7] sm:$0xff] }
  0x13   :  { %328 = vmatmul.msk.f32.vlgmr.msra.gmra.mxu2 %vm72_vm0, %v29_v35  ;;  %329 = vmatmul.msk.f32.vlgmr.msra.gmra.mxu3 %vm72_vm0, %v29_v35  ;;  %v156_v22 = vld [vmem:[%s550_s3] sm:$0xff] }
  0x14   :  { %91 = vmatpush.msra.mxu0 %v30_v36  ;;  %111 = vmatpush.msra.mxu1 %v31_v37 }
  0x15   :  { %326 = vmatmul.msk.f32.vlgmr.msra.gmra.mxu0 %vm72_vm0, %v29_v35  ;;  %327 = vmatmul.msk.f32.vlgmr.msra.gmra.mxu1 %vm72_vm0, %v29_v35 }
  0x16   :  { %69 = vperm.xlu0 %336, %v66_v38   ;;  %338 = vset.pattern.permute.xlu2 %v343_v3 }
  0x17   :  { %285 = vmatpush.msrb.mxu2 %v218_v7  ;;  %305 = vmatpush.msrb.mxu3 %v219_v8 }
  0x18   :  { %245 = vmatpush.msrb.mxu0 %v216_v10  ;;  %265 = vmatpush.msrb.mxu1 %v217_v11 }
  0x19   :  { %208 = vperm.xlu2 %338, %v157_v12  }
  0x1b   :  { %332 = vmatmul.msk.f32.vlgmr.msrb.gmra.mxu2 %vm226_vm2, %v215_v9  ;;  %333 = vmatmul.msk.f32.vlgmr.msrb.gmra.mxu3 %vm226_vm2, %v215_v9 }
  0x1d   :  { %330 = vmatmul.msk.f32.vlgmr.msrb.gmra.mxu0 %vm226_vm2, %v215_v9  ;;  %331 = vmatmul.msk.f32.vlgmr.msrb.gmra.mxu1 %vm226_vm2, %v215_v9 }
  0x21   :  { %223 = vperm.xlu2 %338, %v220_v13  }
  0x73   :  { %v209_v26 = vpop.permute.xlu2 %208 }
  0x7b   :  { %v224_v27 = vpop.permute.xlu2 %223 }
  0x88   :  { %v70_v39 = vpop.permute.xlu0 %69 }
  0x92   :  { %v93_v40 = vpop.f32.mrf.mxu0  ;;  %v113_v41 = vpop.f32.mrf.mxu1 }
  0x93   :  { %v94_v42 = vadd.f32 %v93_v40, %v70_v39  ;;  %v114_v43 = vadd.f32 %v113_v41, %v70_v39 }
  0x95   :  { %v158_v44 = vadd.f32 %v114_v43, %v94_v42 }
  0x96   :  { %v133_v45 = vpop.f32.mrf.mxu2  ;;  %v153_v46 = vpop.f32.mrf.mxu3 }
  0x97   :  { %v134_v47 = vadd.f32 %v133_v45, %v70_v39  ;;  %v154_v49 = vadd.f32 %v153_v46, %v70_v39 }
  0x99   :  { %v159_v48 = vadd.f32 %v158_v44, %v134_v47 }
  0x9a   :  { %v247_v28 = vpop.f32.mrf.mxu0  ;;  %v267_v29 = vpop.f32.mrf.mxu1 }
  0x9b   :  { %v160_v50 = vadd.f32 %v159_v48, %v154_v49  ;;  %v248_v37 = vadd.f32 %v247_v28, %v224_v27  ;;  %v268_v38 = vadd.f32 %v267_v29, %v224_v27 }
  0x9d   :  { %161 = vadd.xlane.f32.xlu0 %v160_v50 }
  0x9e   :  { %v287_v30 = vpop.f32.mrf.mxu2  ;;  %v307_v31 = vpop.f32.mrf.mxu3 }
  0x9f   :  { %v288_v39 = vadd.f32 %v287_v30, %v224_v27  ;;  %v308_v40 = vadd.f32 %v307_v31, %v224_v27 }
 0x110   :  { %v162_v58 = vpop.xlane.xlu0 %161 }
 0x111   :  { %v170_v59 = vmul.f32 %v169_v57, %v162_v58 }
 0x113   :  { %v171_v60 = vsub.f32 %v94_v42, %v170_v59  ;;  %v172_v61 = vsub.f32 %v114_v43, %v170_v59  ;;  %v173_v62 = vsub.f32 %v134_v47, %v170_v59  ;;  %v174_v63 = vsub.f32 %v154_v49, %v170_v59 }
 0x115   :  { %v175_v0 = vmul.f32 %v171_v60, %v171_v60  ;;  %v176_v1 = vmul.f32 %v172_v61, %v172_v61  ;;  %v177_v2 = vmul.f32 %v173_v62, %v173_v62  ;;  %v178_v4 = vmul.f32 %v174_v63, %v174_v63 }
 0x117   :  { %v179_v3 = vadd.f32 %v176_v1, %v175_v0 }
 0x119   :  { %v180_v5 = vadd.f32 %v179_v3, %v177_v2 }
 0x11b   :  { %v181_v6 = vadd.f32 %v180_v5, %v178_v4 }
 0x11d   :  { %182 = vadd.xlane.f32.xlu1 %v181_v6 }
 0x190   :  { %v183_v14 = vpop.xlane.xlu1 %182 }
 0x191   :  { %v184_v15 = vmul.f32 %v183_v14, %v169_v57 }
 0x193   :  { %v185_v16 = vadd.f32 1e-05, %v184_v15 }
 0x195   :  { %341 = vrsqrt.f32 %v185_v16  ;;  %vm192_vm4 = vweird.f32 %v185_v16 }
 0x19b   :  { %v342_v17 = vpop.eup %341 }
 0x19c   :  { %v187_v18 = vmul.f32 %v342_v17, %v185_v16  ;;  %vm193_vm3 = vweird.f32 %v342_v17 }
 0x19d   :  { %vm194_vm5 = vmor %vm192_vm4, %vm193_vm3 }
 0x19e   :  { %v188_v19 = vmul.f32 %v342_v17, %v187_v18 }
 0x1a0   :  { %v189_v20 = vmul.f32 0.5, %v188_v19 }
 0x1a2   :  { %v190_v21 = vsub.f32 1.5, %v189_v20 }
 0x1a4   :  { %v191_v23 = vmul.f32 %v342_v17, %v190_v21 }
 0x1a6   :  { %v195_v24 = vsel %vm194_vm5, %v342_v17, %v191_v23 }
 0x1a7   :  { %v196_v25 = vmul.f32 %v195_v24, %v156_v22 }
 0x1a9   :  { %199 = vperm.xlu1 %337, %v196_v25  }
 0x21b   :  { %v200_v32 = vpop.permute.xlu1 %199 }
 0x21c   :  { %v202_v33 = vmul.f32 %v200_v32, %v171_v60  ;;  %v203_v34 = vmul.f32 %v200_v32, %v172_v61  ;;  %v204_v35 = vmul.f32 %v200_v32, %v173_v62  ;;  %v205_v36 = vmul.f32 %v200_v32, %v174_v63 }
 0x21e   :  { %v211_v41 = vadd.f32 %v209_v26, %v202_v33  ;;  %v212_v42 = vadd.f32 %v209_v26, %v203_v34  ;;  %v213_v43 = vadd.f32 %v209_v26, %v204_v35  ;;  %v214_v44 = vadd.f32 %v209_v26, %v205_v36 }
 0x220   :  { %v310_v45 = vadd.f32 %v248_v37, %v211_v41  ;;  %v311_v46 = vadd.f32 %v268_v38, %v212_v42  ;;  %v312_v47 = vadd.f32 %v288_v39, %v213_v43  ;;  %v313_v48 = vadd.f32 %v308_v40, %v214_v44 }
 0x222   :  { %v314_v49 = vmax.f32 %v310_v45, 0.0  ;;  %v315_v50 = vmax.f32 %v311_v46, 0.0  ;;  %v316_v51 = vmax.f32 %v312_v47, 0.0  ;;  %v317_v52 = vmax.f32 %v313_v48, 0.0 }
 0x224   :  { %318 = vst [vmem:[%s551_s8] sm:$0xff] %v314_v49 }
 0x225   :  { %319 = vst [vmem:[%s551_s8 + $0x8] sm:$0xff] %v315_v50 }
 0x226   :  { %320 = vst [vmem:[%s551_s8 + $0x10] sm:$0xff] %v316_v51 }
 0x227   :  { %321 = vst [vmem:[%s551_s8 + $0x18] sm:$0xff] %v317_v52 }

</bundles_post_ra>
